<compile_context>
chip_gen: v6e
topology: v6e:2x2x1
jax: 0.10.0
libtpu: 0.0.40
codegen_flags: <defaults>
</compile_context>

<pallas_src>
import jax
import jax.numpy as jnp
from jax.experimental import pallas as pl
from jax.experimental.pallas import tpu as pltpu

IN_DIM = 28 * 28     # 784
HID_DIM = 256
OUT_DIM = 10
OUT_PAD = 128        # lane-dense padded output width
DEFAULT_TB = 1024    # batch tile (rows per grid step)


def _round_up(x, m):
    return ((x + m - 1) // m) * m


def _round_down(x, m):
    return (x // m) * m


def _choose_tb(B, block_b):
    """Pick a batch tile: multiple of 8, <= B (or == B for tiny batches),
    split into >=2 grid steps when the whole batch would fit one tile so
    v7x's two TensorCores both engage."""
    block_b = max(8, _round_down(block_b, 8))
    if B < 8:
        return B                       # block dim == full array dim (allowed)
    tb = min(block_b, _round_down(B, 8))
    if tb >= B and B >= 16:            # whole batch fit one tile -> split in 2
        tb = _round_up((B + 1) // 2, 8)
    return tb


def prepare_params(w1, b1, w2, b2):
    """One-time weight prep (hoisted off the per-call hot path).
    w1: (784, 256), b1: (256,), w2: (256, 10), b2: (10,)  [torch W.T layout]."""
    w1_bf = w1.astype(jnp.bfloat16)
    b1_2d = b1.reshape(1, HID_DIM).astype(jnp.float32)
    w2_pad = jnp.zeros((HID_DIM, OUT_PAD), jnp.bfloat16)
    w2_pad = w2_pad.at[:, :OUT_DIM].set(w2.astype(jnp.bfloat16))
    b2_pad = jnp.zeros((1, OUT_PAD), jnp.float32)
    b2_pad = b2_pad.at[0, :OUT_DIM].set(b2.astype(jnp.float32))
    return w1_bf, b1_2d, w2_pad, b2_pad


def mlp_kernel(x_ref, w1_ref, b1_ref, w2_ref, b2_ref, o_ref):
    # x_ref: (TB, 784) f32      w1_ref: (784, 256) bf16   b1_ref: (1, 256) f32
    # w2_ref: (256, 128) bf16   b2_ref: (1, 128) f32      o_ref: (TB, 128) f32
    x = x_ref[...].astype(jnp.bfloat16)          # in-kernel cast (VPU, free-ish)
    # Linear 1: bf16 MXU, f32 accumulate, bias + ReLU in f32.
    h = jnp.dot(x, w1_ref[...], preferred_element_type=jnp.float32) + b1_ref[...]
    h = jnp.maximum(h, 0.0)
    # Linear 2: cast activations to bf16 for the MXU, accumulate f32.
    y = jnp.dot(h.astype(jnp.bfloat16), w2_ref[...],
                preferred_element_type=jnp.float32) + b2_ref[...]
    o_ref[...] = y.astype(o_ref.dtype)


def mlp_forward(x_nchw, params, *, block_b=DEFAULT_TB):
    """x_nchw: (B, 1, 28, 28) f32; params from prepare_params().
    Returns (B, 10) f32 logits (== torch MLPNet.forward up to bf16 matmuls)."""
    w1_bf, b1_2d, w2_pad, b2_pad = params
    B = x_nchw.shape[0]
    x2d = x_nchw.reshape(B, IN_DIM)              # torch x.view(-1, 784); no cast

    TB = _choose_tb(B, block_b)
    grid = (pl.cdiv(B, TB),)                     # trailing partial block is masked

    cost = pl.CostEstimate(
        flops=2 * B * (IN_DIM * HID_DIM + HID_DIM * OUT_PAD),
        transcendentals=0,
        bytes_accessed=(B * IN_DIM * 4            # x (f32)
                        + w1_bf.size * 2 + w2_pad.size * 2
                        + b1_2d.size * 4 + b2_pad.size * 4
                        + B * OUT_PAD * 4),       # logits (f32)
    )

    out = pl.pallas_call(
        mlp_kernel,
        out_shape=jax.ShapeDtypeStruct((B, OUT_PAD), jnp.float32),
        grid_spec=pltpu.PrefetchScalarGridSpec(
            num_scalar_prefetch=0,
            grid=grid,
            in_specs=[
                # activations: streamed, one batch tile per grid step
                pl.BlockSpec((TB, IN_DIM), lambda i: (i, 0)),
                # weights / biases: constant index_map -> stay VMEM-resident
                pl.BlockSpec((IN_DIM, HID_DIM), lambda i: (0, 0)),
                pl.BlockSpec((1, HID_DIM), lambda i: (0, 0)),
                pl.BlockSpec((HID_DIM, OUT_PAD), lambda i: (0, 0)),
                pl.BlockSpec((1, OUT_PAD), lambda i: (0, 0)),
            ],
            out_specs=pl.BlockSpec((TB, OUT_PAD), lambda i: (i, 0)),
        ),
        compiler_params=pltpu.CompilerParams(
            dimension_semantics=("parallel",),   # shards batch tiles across v7x's 2 TCs
            vmem_limit_bytes=32 * 1024 * 1024),  # headroom for TB=1024 f32 x on v5e
        cost_estimate=cost,
    )(x2d, w1_bf, b1_2d, w2_pad, b2_pad)

    # TODO(synk): if the consumer can read the padded (B, 128) buffer directly,
    # drop this slice to save the extra HBM pass.
    return out[:, :OUT_DIM]


def init_params(key):
    """Deterministic init matching nn.Linear shapes; torch stores (out, in),
    we transpose to (in, out) for the kernel layout."""
    k1, k2, k3, k4 = jax.random.split(key, 4)
    lim1 = 1.0 / jnp.sqrt(IN_DIM)
    lim2 = 1.0 / jnp.sqrt(HID_DIM)
    w1_t = jax.random.uniform(k1, (HID_DIM, IN_DIM), jnp.float32, -lim1, lim1)
    b1 = jax.random.uniform(k2, (HID_DIM,), jnp.float32, -lim1, lim1)
    w2_t = jax.random.uniform(k3, (OUT_DIM, HID_DIM), jnp.float32, -lim2, lim2)
    b2 = jax.random.uniform(k4, (OUT_DIM,), jnp.float32, -lim2, lim2)
    return w1_t.T, b1, w2_t.T, b2


def reference_forward(x_nchw, w1, b1, w2, b2):
    """Pure-JAX reference matching the kernel's bf16-matmul / f32-accumulate numerics."""
    B = x_nchw.shape[0]
    x2d = x_nchw.reshape(B, IN_DIM).astype(jnp.bfloat16).astype(jnp.float32)
    w1f = w1.astype(jnp.bfloat16).astype(jnp.float32)
    w2f = w2.astype(jnp.bfloat16).astype(jnp.float32)
    h = jnp.maximum(
        jnp.dot(x2d, w1f, precision=jax.lax.Precision.HIGHEST) + b1, 0.0)
    hb = h.astype(jnp.bfloat16).astype(jnp.float32)
    return jnp.dot(hb, w2f, precision=jax.lax.Precision.HIGHEST) + b2


if __name__ == "__main__":
    key = jax.random.PRNGKey(0)
    kx, kp = jax.random.split(key)
    B = 10  # ragged batch: exercises the masked trailing partial block (B % 8 != 0)
    x = jax.random.normal(kx, (B, 1, 28, 28), jnp.float32)  # NCHW, MNIST-like
    w1, b1, w2, b2 = init_params(kp)

    params = prepare_params(w1, b1, w2, b2)      # one-time weight prep
    out = jax.block_until_ready(mlp_forward(x, params))
    ref = reference_forward(x, w1, b1, w2, b2)

    assert out.shape == (B, OUT_DIM), out.shape
    assert jnp.allclose(out, ref, atol=2e-3, rtol=2e-2), (
        float(jnp.max(jnp.abs(out - ref))))
    print("KERNEL_OK")
</pallas_src>

<mosaic_0001>
module attributes {stable_mosaic.version = 11 : i64} {
  func.func @mlp_kernel(%arg0: i32, %arg1: memref<8x784xf32, #tpu.memory_space<vmem>>, %arg2: memref<784x256xbf16, #tpu.memory_space<vmem>>, %arg3: memref<1x256xf32, #tpu.memory_space<vmem>>, %arg4: memref<256x128xbf16, #tpu.memory_space<vmem>>, %arg5: memref<1x128xf32, #tpu.memory_space<vmem>>, %arg6: memref<8x128xf32, #tpu.memory_space<vmem>>) attributes {dimension_semantics = [#tpu.dimension_semantics<parallel>], iteration_bounds = array<i64: 2>, scalar_prefetch = 0 : i64, scratch_operands = 0 : i64, tpu.core_type = #tpu.core_type<tc>, window_params = [{transform_indices = @transform_0, window_bounds = array<i64: 8, 784>}, {pipeline_mode = #tpu.pipeline_mode<synchronous>, transform_indices = @transform_1, window_bounds = array<i64: 784, 256>}, {pipeline_mode = #tpu.pipeline_mode<synchronous>, transform_indices = @transform_2, window_bounds = array<i64: 1, 256>}, {pipeline_mode = #tpu.pipeline_mode<synchronous>, transform_indices = @transform_3, window_bounds = array<i64: 256, 128>}, {pipeline_mode = #tpu.pipeline_mode<synchronous>, transform_indices = @transform_4, window_bounds = array<i64: 1, 128>}, {transform_indices = @transform_5, window_bounds = array<i64: 8, 128>}]} {
    %c0 = arith.constant 0 : index
    %c0_0 = arith.constant 0 : index
    %0 = vector.load %arg1[%c0, %c0_0] : memref<8x784xf32, #tpu.memory_space<vmem>>, vector<8x784xf32>
    %1 = arith.truncf %0 : vector<8x784xf32> to vector<8x784xbf16>
    %c0_1 = arith.constant 0 : index
    %c0_2 = arith.constant 0 : index
    %2 = vector.load %arg2[%c0_1, %c0_2] : memref<784x256xbf16, #tpu.memory_space<vmem>>, vector<784x256xbf16>
    %cst = arith.constant dense<0.000000e+00> : vector<8x256xf32>
    %3 = tpu.matmul %1, %2, %cst {dimension_numbers = #tpu.dot_dimension_numbers<[1], [0], [0], [1], [0, 0, 1, 1], [], []>} : vector<8x784xbf16>, vector<784x256xbf16>, vector<8x256xf32> -> vector<8x256xf32>
    %c0_3 = arith.constant 0 : index
    %c0_4 = arith.constant 0 : index
    %4 = vector.load %arg3[%c0_3, %c0_4] : memref<1x256xf32, #tpu.memory_space<vmem>>, vector<1x256xf32>
    %5 = vector.broadcast %4 : vector<1x256xf32> to vector<8x256xf32>
    %6 = arith.addf %3, %5 : vector<8x256xf32>
    %cst_5 = arith.constant 0.000000e+00 : f32
    %7 = vector.broadcast %cst_5 : f32 to vector<8x256xf32>
    %8 = arith.maximumf %6, %7 : vector<8x256xf32>
    %9 = arith.truncf %8 : vector<8x256xf32> to vector<8x256xbf16>
    %c0_6 = arith.constant 0 : index
    %c0_7 = arith.constant 0 : index
    %10 = vector.load %arg4[%c0_6, %c0_7] : memref<256x128xbf16, #tpu.memory_space<vmem>>, vector<256x128xbf16>
    %cst_8 = arith.constant dense<0.000000e+00> : vector<8x128xf32>
    %11 = tpu.matmul %9, %10, %cst_8 {dimension_numbers = #tpu.dot_dimension_numbers<[1], [0], [0], [1], [0, 0, 1, 1], [], []>} : vector<8x256xbf16>, vector<256x128xbf16>, vector<8x128xf32> -> vector<8x128xf32>
    %c0_9 = arith.constant 0 : index
    %c0_10 = arith.constant 0 : index
    %12 = vector.load %arg5[%c0_9, %c0_10] : memref<1x128xf32, #tpu.memory_space<vmem>>, vector<1x128xf32>
    %13 = vector.broadcast %12 : vector<1x128xf32> to vector<8x128xf32>
    %14 = arith.addf %11, %13 : vector<8x128xf32>
    %c0_11 = arith.constant 0 : index
    %c0_12 = arith.constant 0 : index
    %15 = vector.load %arg6[%c0_11, %c0_12] : memref<8x128xf32, #tpu.memory_space<vmem>>, vector<8x128xf32>
    tpu.vector_store %arg6[%c0_11, %c0_12], %14 {strides = array<i32>} : memref<8x128xf32, #tpu.memory_space<vmem>>, vector<8x128xf32>,
    return
  }
  func.func @transform_0(%arg0: i32) -> (i32, i32) {
    %c0_i32 = arith.constant 0 : i32
    %c0_i32_0 = arith.constant 0 : i32
    return %arg0, %c0_i32 : i32, i32
  }
  func.func @transform_1(%arg0: i32) -> (i32, i32) {
    %c0_i32 = arith.constant 0 : i32
    %c0_i32_0 = arith.constant 0 : i32
    %c0_i32_1 = arith.constant 0 : i32
    return %c0_i32, %c0_i32_0 : i32, i32
  }
  func.func @transform_2(%arg0: i32) -> (i32, i32) {
    %c0_i32 = arith.constant 0 : i32
    %c0_i32_0 = arith.constant 0 : i32
    %c0_i32_1 = arith.constant 0 : i32
    return %c0_i32, %c0_i32_0 : i32, i32
  }
  func.func @transform_3(%arg0: i32) -> (i32, i32) {
    %c0_i32 = arith.constant 0 : i32
    %c0_i32_0 = arith.constant 0 : i32
    %c0_i32_1 = arith.constant 0 : i32
    return %c0_i32, %c0_i32_0 : i32, i32
  }
  func.func @transform_4(%arg0: i32) -> (i32, i32) {
    %c0_i32 = arith.constant 0 : i32
    %c0_i32_0 = arith.constant 0 : i32
    %c0_i32_1 = arith.constant 0 : i32
    return %c0_i32, %c0_i32_0 : i32, i32
  }
  func.func @transform_5(%arg0: i32) -> (i32, i32) {
    %c0_i32 = arith.constant 0 : i32
    %c0_i32_0 = arith.constant 0 : i32
    return %arg0, %c0_i32 : i32, i32
  }
}

</mosaic_0001>

<bundles_post_ra>
// kernel: tpu_custom_call.1
= control target key start
LH: loop header
LB: loop body
LE: loop exit
PB: predicated region body
PF: predicated region fallthrough
CT: control target
= control target key end

     0   :  { %10 = vsyncpa [#allocation3], 0  ;;  %s2103_s0 = inlined_call_operand.hbm [shape: f32[10,784], index: 0, kind: input, shape index: {}]   ;;  %s2104_s1 = inlined_call_operand.hbm [shape: bf16[784,256], index: 1, kind: input, shape index: {}]   ;;  %s2105_s2 = inlined_call_operand.vmem [shape: f32[1,256], index: 2, kind: input, shape index: {}]   ;;  %s2106_s3 = inlined_call_operand.hbm [shape: bf16[256,128], index: 3, kind: input, shape index: {}]   ;;  %s2107_s4 = inlined_call_operand.vmem [shape: f32[1,128], index: 4, kind: input, shape index: {}]   ;;  %s2108_s5 = inlined_call_operand.hbm [shape: f32[10,128], index: 5, kind: output, shape index: {}]  }
   0x1   :  { %12 = vsyncpa [#allocation3 + $0x1], 0 }
   0x2   :  { %13 = vsyncpa [#allocation6], 0 }
   0x3   :  { %14 = vsyncpa [#allocation4], 0 }
   0x4   :  { %16 = vsyncpa [#allocation4 + $0x1], 0  ;;  %s1915_s18 = smov 0   ;;  %s1917_s19 = smov 0  }
   0x5   :  { %s1919_s20 = smov 0   ;;  %s1921_s21 = smov 0  }
   0x6 LB: > { %s1936_s22 = sadd.s32 4294967295, %s1874_s21   ;;  %s1336_s23 = sadd.s32 4294967294, %s1874_s21   ;;  %s1874_s21 = sphi %s1921_s21, %s2130_s21   ;;  %s1870_s20 = sphi %s1919_s20, %s2129_s20   ;;  %s1866_s19 = sphi %s1917_s19, %s2128_s19   ;;  %s1862_s18 = sphi %s1915_s18, %s2127_s18  }
   0x7   : > { %p42_p0 = scmp.ne.s32.totalorder %s1866_s19, %s1862_s18  ;;  %p2109_p1 = scmp.eq.s32.totalorder %s1936_s22, 0 }
   0x8   : > { %p156_p3 = scmp.eq.s32.totalorder %s1336_s23, 1  ;;  %p1337_p5 = scmp.ge.s32.totalorder %s1874_s21, 1 }
   0x9   : > { %p1945_p4 = por %p2109_p1, %p42_p0  ;;  %p163_p7 = scmp.lt.s32.totalorder %s1874_s21, 3 }
   0xa   : > { %p1950_p6 = por %p156_p3, %p42_p0  ;;  %s1876_s27 = smov [#allocation5]  }
   0xb   : > { %s2113_s24 = scalar_select %p1945_p4, 1, 0 }
   0xc   : > { %s2114_s25 = scalar_select %p1950_p6, 1, 0 }
   0xd   : > { %p1955_p8 = pnand %p1337_p5, %p163_p7  ;;  %s175_s28 = sshll.u32 %s1876_s27, 4  ;;  %s176_s28 = int_to_ptr.vmem [resolvable:$true] %s175_s28 }
   0xe   : > { %s1877_s30 = smov [#allocation7]   ;;  %s1737_s7 = scalar_lea.vmem %s176_s28, 12544 }
   0xf   : > { %s2115_s26 = scalar_select %p1955_p8, 1, 0 }
  0x10   : > { %p1503_p9 = pneg %p1955_p8  ;;  %s191_s6 = sshll.u32 %s1877_s30, 4  ;;  %s192_s6 = int_to_ptr.vmem [resolvable:$true] %s191_s6 }
  0x11   : > { %p1738_p13 = scmp.ne.s32.totalorder %s176_s28, %s1737_s7  ;;  %p1745_p5 = scmp.lt.s32.totalorder %s176_s28, %s176_s28 }
  0x12   : > { %p1964_p11 = pnand %p1503_p9, %p2109_p1  ;;  %p1746_p7 = scmp.lt.s32.totalorder %s1737_s7, %s1737_s7 }
  0x14   : > { %p1728_p12 = pneg %p1964_p11  ;;  %p1747_p10 = por %p1746_p7, %p1745_p5 }
  0x16   : > { %p1740_p0 = pnand %p1738_p13, %p1728_p12 }
  0x18   : > { %p1741_p3 = pneg %p1740_p0 }
  0x1a   : > { %p1748_p9 = pnand %p1747_p10, %p1741_p3 }
  0x1c   : > { %1751 = shalt.err (!%p1748_p9)
}
  0x1d   : > { %s1878_s8 = smov 128   ;;  %s1879_s9 = smov 8  }
  0x1e   : > { %1506 = dma.hbm_to_vmem [thread:$0]  (!%p1964_p11), %s2104_s1, 12544, %s176_s28, [#allocation6], %s1878_s8, %s1878_s8, %s1879_s9  }
  0x1f   : > { %s1763_s12 = scalar_lea.vmem %s192_s6, 2048  ;;  %p1771_p2 = scmp.lt.s32.totalorder %s192_s6, %s192_s6 }
  0x20   : > { %p1764_p1 = scmp.ne.s32.totalorder %s192_s6, %s1763_s12  ;;  %p1772_p6 = scmp.lt.s32.totalorder %s1763_s12, %s1763_s12 }
  0x22   : > { %p1766_p13 = pnand %p1764_p1, %p1728_p12  ;;  %p1773_p5 = por %p1772_p6, %p1771_p2 }
  0x24   : > { %p1767_p0 = pneg %p1766_p13 }
  0x26   : > { %p1774_p10 = pnand %p1773_p5, %p1767_p0 }
  0x28   : > { %1777 = shalt.err (!%p1774_p10)
}
  0x29   : > { %s1880_s13 = smov 64   ;;  %s1881_s14 = smov 4  }
  0x2a   : > { %1509 = dma.hbm_to_vmem [thread:$0]  (!%p1964_p11), %s2106_s3, 2048, %s192_s6, [#allocation6], %s1880_s13, %s1880_s13, %s1881_s14  }
  0x2b   : > { %s1987_s17 = sadd.s32 1, %s1874_s21   ;;  %s29_s27 = sadd.s32 1, %s1870_s20 }
  0x2c   : > { %s26_s23 = ssub.s32 %s1874_s21, %s1987_s17  ;;  %p36_p2 = scmp.ne.s32.totalorder %s1870_s20, %s1866_s19 }
  0x2d   : > { %p27_p1 = scmp.eq.s32.totalorder %s26_s23, 0  ;;  %p37_p6 = scmp.eq.s32.totalorder %s1874_s21, 0 }
  0x2e   : > { %p2117_p3 = scmp.eq.s32.totalorder %s1936_s22, 1  ;;  %p1520_p9 = scmp.lt.s32.totalorder %s1874_s21, 2 }
  0x2f   : > { %s1996_s28 = scalar_select %p27_p1, %s1870_s20, %s29_s27  }
  0x30   : > { %p38_p12 = por %p37_p6, %p36_p2  ;;  %p2000_p7 = por %p2117_p3, %p36_p2 }
  0x31   : > { %s208_s29 = sand.u32 1, %s1870_s20   ;;  %s1489_s6 = smul.u32 896, %s1874_s21 }
  0x32   : > { %s2118_s30 = scalar_select %p2000_p7, 1, 0 }
  0x33   : > { %s1488_s7 = smul.u32 56, %s208_s29  ;;  %p2007_p11 = pnand %p1520_p9, %p38_p12 }
  0x34   : > { %s2014_s11 = scalar_lea.hbm %s2103_s0, %s1489_s6  ;;  %s209_s14 = scalar_lea.sflag [#allocation3], %s208_s29 }
  0x35   : > { %s212_s12 = scalar_lea.vmem [#allocation2], %s1488_s7  ;;  %s1778_s15 = scalar_lea.hbm %s2014_s11, 896 }
  0x36   : > { %s220_s13 = sshll.u32 %s212_s12, 4  ;;  %p1779_p13 = scmp.ne.s32.totalorder %s2014_s11, %s1778_s15  ;;  %s221_s13 = int_to_ptr.vmem [resolvable:$true] %s220_s13 }
  0x37   : > { %p1780_p0 = pneg %p2007_p11  ;;  %s1783_s27 = scalar_lea.hbm %s2103_s0, 1792 }
  0x38   : > { %p1784_p1 = scmp.lt.s32.totalorder %s2014_s11, %s2103_s0  ;;  %p1785_p2 = scmp.lt.s32.totalorder %s1783_s27, %s1778_s15 }
  0x39   : > { %p1781_p5 = pnand %p1780_p0, %p1779_p13 }
  0x3a   : > { %p1786_p6 = por %p1785_p2, %p1784_p1 }
  0x3b   : > { %p1782_p10 = pneg %p1781_p5 }
  0x3d   : > { %p1787_p12 = pnand %p1786_p6, %p1782_p10 }
  0x3f   : > { %1790 = shalt.err (!%p1787_p12)
}
  0x40   : > { %s1791_s7 = scalar_lea.vmem %s221_s13, 896  ;;  %s1882_s29 = smov [#allocation2]  }
  0x41   : > { %p1792_p3 = scmp.ne.s32.totalorder %s221_s13, %s1791_s7  ;;  %s1796_s10 = sshll.u32 %s1882_s29, 4  ;;  %s1797_s10 = int_to_ptr.vmem [resolvable:$false] %s1796_s10 }
  0x42   : > { %s1798_s12 = scalar_lea.vmem %s1797_s10, 1792  ;;  %p1799_p13 = scmp.lt.s32.totalorder %s221_s13, %s1797_s10 }
  0x43   : > { %p1794_p9 = pnand %p1792_p3, %p1780_p0  ;;  %p1800_p5 = scmp.lt.s32.totalorder %s1798_s12, %s1791_s7 }
  0x45   : > { %p1795_p7 = pneg %p1794_p9  ;;  %p1801_p4 = por %p1800_p5, %p1799_p13 }
  0x47   : > { %p1802_p8 = pnand %p1801_p4, %p1795_p7 }
  0x49   : > { %1805 = shalt.err (!%p1802_p8)
}
  0x4a   : > { %1513 = dma.hbm_to_vmem [thread:$0]  (!%p2007_p11), %s2014_s11, 896, %s221_s13, %s209_s14  }
  0x4b   : > { %p2120_p10 = scmp.ne.s32.totalorder %s2115_s26, 0 }
  0x4c   : > { %s2033_s15 = sand.u32 (!%p2120_p10), 1, %s1866_s19   ;;  %p2121_p0 = scmp.ne.s32.totalorder (!%p2120_p10), %s2113_s24, 0 }
  0x4d   : > { %229 = sbr.rel (%p2120_p10) target bundleno = 631 (0x277), region = 40  ;;  %s232_s23 = scalar_lea.sflag (!%p2120_p10), [#allocation3], %s2033_s15 }
  0x4e   : > { %s1490_s16 = smul.u32 (!%p2120_p10), 56, %s2033_s15 }
  0x50   : > { %s2037_s27 = scalar_lea.vmem (!%p2120_p10), [#allocation2], %s1490_s16 }
  0x52   : > { %1849 = dma.done.wait (%p2121_p0), %s232_s23, 896  }
  0x53   : > { %1851 = vsyncadd (%p2121_p0), %s232_s23, 4294966400  ;;  %p2122_p4 = scmp.eq.s32.totalorder %s1936_s22, 0 }
  0x55   : > { %1853 = dma.done.wait (%p2122_p4), [#allocation6], 14592   ;;  %p2123_p8 = pmov %p2122_p4 }
  0x56   : > { %v1563_v0 = vld [vmem:[#allocation5 + $0x74] ss:$8 sps:$4 sm:$0xff]   ;;  %v1565_v1 = vld [vmem:[#allocation5 + $0x70] ss:$8 sps:$4 sm:$0xff]   ;;  %v1569_v4 = vld [vmem:[#allocation5 + $0x64] ss:$8 sps:$4 sm:$0xff]  }
  0x57   : > { %1855 = vsyncadd (%p2123_p8), [#allocation6], 4294952704  ;;  %889 = vmatprep.subr.bf16.mxu0 %v1563_v0  ;;  %v1566_v2 = vld [vmem:[#allocation5 + $0x174] ss:$8 sps:$4 sm:$0xff]   ;;  %v1568_v3 = vld [vmem:[#allocation5 + $0x170] ss:$8 sps:$4 sm:$0xff]  }
  0x58   : > { %890 = vmatpush1.bf16.msra.mxu0 %v1565_v1  ;;  %v1571_v5 = vld [vmem:[#allocation5 + $0x60] ss:$8 sps:$4 sm:$0xff]   ;;  %930 = vmatprep.subr.bf16.mxu1 %v1566_v2  ;;  %v1572_v6 = vld [vmem:[#allocation5 + $0x164] ss:$8 sps:$4 sm:$0xff]   ;;  %v1575_v8 = vld [vmem:[#allocation5 + $0x54] ss:$8 sps:$4 sm:$0xff]  }
  0x59   : > { %931 = vmatpush1.bf16.msra.mxu1 %v1568_v3  ;;  %891 = vmatprep.subr.bf16.mxu0 %v1569_v4  ;;  %v1574_v7 = vld [vmem:[#allocation5 + $0x160] ss:$8 sps:$4 sm:$0xff]   ;;  %v1577_v9 = vld [vmem:[#allocation5 + $0x50] ss:$8 sps:$4 sm:$0xff]   ;;  %v1578_v10 = vld [vmem:[#allocation5 + $0x154] ss:$8 sps:$4 sm:$0xff]  }
  0x5a   : > { %932 = vmatprep.subr.bf16.mxu1 %v1572_v6  ;;  %v1581_v11 = vld [vmem:[#allocation5 + $0x44] ss:$8 sps:$4 sm:$0xff]   ;;  %v1580_v12 = vld [vmem:[#allocation5 + $0x150] ss:$8 sps:$4 sm:$0xff]   ;;  %v1583_v14 = vld [vmem:[#allocation5 + $0x40] ss:$8 sps:$4 sm:$0xff]  }
  0x5b   : > { %v1584_v13 = vld [vmem:[#allocation5 + $0x144] ss:$8 sps:$4 sm:$0xff]   ;;  %v1587_v15 = vld [vmem:[#allocation5 + $0x34] ss:$8 sps:$4 sm:$0xff]   ;;  %v1586_v16 = vld [vmem:[#allocation5 + $0x140] ss:$8 sps:$4 sm:$0xff]  }
  0x5c   : > { %892 = vmatpush1.bf16.msra.mxu0 %v1571_v5  ;;  %v1590_v17 = vld [vmem:[#allocation5 + $0x134] ss:$8 sps:$4 sm:$0xff]   ;;  %v1589_v18 = vld [vmem:[#allocation5 + $0x30] ss:$8 sps:$4 sm:$0xff]   ;;  %v1593_v19 = vld [vmem:[#allocation5 + $0x24] ss:$8 sps:$4 sm:$0xff]  }
  0x5d   : > { %893 = vmatprep.subr.bf16.mxu0 %v1575_v8  ;;  %933 = vmatpush1.bf16.msra.mxu1 %v1574_v7  ;;  %v1592_v20 = vld [vmem:[#allocation5 + $0x130] ss:$8 sps:$4 sm:$0xff]   ;;  %v1596_v21 = vld [vmem:[#allocation5 + $0x124] ss:$8 sps:$4 sm:$0xff]   ;;  %v1595_v22 = vld [vmem:[#allocation5 + $0x20] ss:$8 sps:$4 sm:$0xff]  }
  0x5e   : > { %934 = vmatprep.subr.bf16.mxu1 %v1578_v10  ;;  %v1599_v23 = vld [vmem:[#allocation5 + $0x14] ss:$8 sps:$4 sm:$0xff]   ;;  %v1598_v24 = vld [vmem:[#allocation5 + $0x120] ss:$8 sps:$4 sm:$0xff]   ;;  %v1601_v26 = vld [vmem:[#allocation5 + $0x10] ss:$8 sps:$4 sm:$0xff]  }
  0x5f   : > { %v1602_v25 = vld [vmem:[#allocation5 + $0x114] ss:$8 sps:$4 sm:$0xff]   ;;  %v1605_v27 = vld [vmem:[#allocation5 + $0x4] ss:$8 sps:$4 sm:$0xff]   ;;  %v1604_v28 = vld [vmem:[#allocation5 + $0x110] ss:$8 sps:$4 sm:$0xff]  }
  0x60   : > { %894 = vmatpush1.bf16.msra.mxu0 %v1577_v9  ;;  %v1608_v29 = vld [vmem:[#allocation5 + $0x104] ss:$8 sps:$4 sm:$0xff]   ;;  %v1607_v30 = vld [vmem:[#allocation5] ss:$8 sps:$4 sm:$0xff]   ;;  %v1611_v31 = vld [vmem:[#allocation5 + $0xf4] ss:$8 sps:$4 sm:$0xff]  }
  0x61   : > { %895 = vmatprep.subr.bf16.mxu0 %v1581_v11  ;;  %935 = vmatpush1.bf16.msra.mxu1 %v1580_v12  ;;  %v1610_v32 = vld [vmem:[#allocation5 + $0x100] ss:$8 sps:$4 sm:$0xff]   ;;  %v1614_v33 = vld [vmem:[#allocation5 + $0x1f4] ss:$8 sps:$4 sm:$0xff]   ;;  %v1613_v34 = vld [vmem:[#allocation5 + $0xf0] ss:$8 sps:$4 sm:$0xff]  }
  0x62   : > { %936 = vmatprep.subr.bf16.mxu1 %v1584_v13  ;;  %v1617_v35 = vld [vmem:[#allocation5 + $0xe4] ss:$8 sps:$4 sm:$0xff]   ;;  %v1616_v36 = vld [vmem:[#allocation5 + $0x1f0] ss:$8 sps:$4 sm:$0xff]   ;;  %v1619_v38 = vld [vmem:[#allocation5 + $0xe0] ss:$8 sps:$4 sm:$0xff]  }
  0x63   : > { %v1620_v37 = vld [vmem:[#allocation5 + $0x1e4] ss:$8 sps:$4 sm:$0xff]   ;;  %v1623_v39 = vld [vmem:[#allocation5 + $0xd4] ss:$8 sps:$4 sm:$0xff]   ;;  %v1622_v40 = vld [vmem:[#allocation5 + $0x1e0] ss:$8 sps:$4 sm:$0xff]  }
  0x64   : > { %896 = vmatpush1.bf16.msra.mxu0 %v1583_v14  ;;  %v1626_v41 = vld [vmem:[#allocation5 + $0x1d4] ss:$8 sps:$4 sm:$0xff]   ;;  %v1625_v42 = vld [vmem:[#allocation5 + $0xd0] ss:$8 sps:$4 sm:$0xff]   ;;  %v1629_v43 = vld [vmem:[#allocation5 + $0xc4] ss:$8 sps:$4 sm:$0xff]  }
  0x65   : > { %897 = vmatprep.subr.bf16.mxu0 %v1587_v15  ;;  %937 = vmatpush1.bf16.msra.mxu1 %v1586_v16  ;;  %v1628_v44 = vld [vmem:[#allocation5 + $0x1d0] ss:$8 sps:$4 sm:$0xff]   ;;  %v1632_v45 = vld [vmem:[#allocation5 + $0x1c4] ss:$8 sps:$4 sm:$0xff]   ;;  %v1631_v47 = vld [vmem:[#allocation5 + $0xc0] ss:$8 sps:$4 sm:$0xff]  }
  0x66   : > { %938 = vmatprep.subr.bf16.mxu1 %v1590_v17  ;;  %v272_v46 = vld [vmem:[%s2037_s27 + $0x8] sm:$0xff]  ;;  %v274_v50 = vld [vmem:[%s2037_s27 + $0x18] sm:$0xff]  ;;  %v271_v4 = vld [vmem:[%s2037_s27] sm:$0xff]  ;;  %vm885_vm0 = vcmask 130048   ;;  %s1345_s8 = sshll.u32 %s2033_s15, 3  ;;  %s1463_s14 = sshll.u32 %s1936_s22, 7 }
  0x67   : > { %v279_v48 = vpack.c.bf16 %v272_v46, %v272_v46  ;;  %v1635_v49 = vld [vmem:[#allocation5 + $0xb4] ss:$8 sps:$4 sm:$0xff]   ;;  %v1634_v51 = vld [vmem:[#allocation5 + $0x1c0] ss:$8 sps:$4 sm:$0xff]   ;;  %v281_v52 = vpack.c.bf16 %v274_v50, %v274_v50  ;;  %v1637_v54 = vld [vmem:[#allocation5 + $0xb0] ss:$8 sps:$4 sm:$0xff]   ;;  %v278_v7 = vpack.c.bf16 %v271_v4, %v271_v4  ;;  %s2066_s10 = scalar_lea.hbm %s2108_s5, %s1463_s14 }
  0x68   : > { %898 = vmatpush1.bf16.msra.mxu0 %v1589_v18  ;;  %v1638_v53 = vld [vmem:[#allocation5 + $0x1b4] ss:$8 sps:$4 sm:$0xff]   ;;  %v1641_v55 = vld [vmem:[#allocation5 + $0xa4] ss:$8 sps:$4 sm:$0xff]   ;;  %v1640_v56 = vld [vmem:[#allocation5 + $0x1b0] ss:$8 sps:$4 sm:$0xff]  }
  0x69   : > { %899 = vmatprep.subr.bf16.mxu0 %v1593_v19  ;;  %939 = vmatpush1.bf16.msra.mxu1 %v1592_v20  ;;  %v1644_v57 = vld [vmem:[#allocation5 + $0x1a4] ss:$8 sps:$4 sm:$0xff]   ;;  %v1643_v58 = vld [vmem:[#allocation5 + $0xa0] ss:$8 sps:$4 sm:$0xff]   ;;  %v1647_v59 = vld [vmem:[#allocation5 + $0x94] ss:$8 sps:$4 sm:$0xff]  }
  0x6a   : > { %940 = vmatprep.subr.bf16.mxu1 %v1596_v21  ;;  %921 = vmatprep.mubr.bf16.mxu0 %v279_v48  ;;  %v1646_v60 = vld [vmem:[#allocation5 + $0x1a0] ss:$8 sps:$4 sm:$0xff]   ;;  %v1650_v61 = vld [vmem:[#allocation5 + $0x194] ss:$8 sps:$4 sm:$0xff]   ;;  %v1649_v62 = vld [vmem:[#allocation5 + $0x90] ss:$8 sps:$4 sm:$0xff]  }
  0x6b   : > { %962 = vmatprep.mubr.bf16.mxu1 %v281_v52  ;;  %v1653_v63 = vld [vmem:[#allocation5 + $0x84] ss:$8 sps:$4 sm:$0xff]   ;;  %v1652_v0 = vld [vmem:[#allocation5 + $0x190] ss:$8 sps:$4 sm:$0xff]   ;;  %v1655_v1 = vld [vmem:[#allocation5 + $0x80] ss:$8 sps:$4 sm:$0xff]  }
  0x6c   : > { %900 = vmatpush1.bf16.msra.mxu0 %v1595_v22  ;;  %v1656_v2 = vld [vmem:[#allocation5 + $0x184] ss:$8 sps:$4 sm:$0xff]   ;;  %v1658_v3 = vld [vmem:[#allocation5 + $0x180] ss:$8 sps:$4 sm:$0xff]   ;;  %v1661_v5 = vld [vmem:[#allocation5 + $0x274] ss:$8 sps:$4 sm:$0xff]  }
  0x6d   : > { %901 = vmatprep.subr.bf16.mxu0 %v1599_v23  ;;  %941 = vmatpush1.bf16.msra.mxu1 %v1598_v24  ;;  %v273_v6 = vld [vmem:[%s2037_s27 + $0x10] sm:$0xff]  ;;  %v276_v16 = vld [vmem:[%s2037_s27 + $0x28] sm:$0xff]  ;;  %v1883_v19 = vmov 0   ;;  %v1711_v50 = vld [vmem:[#allocation7 + $0x38] sm:$0xff]   ;;  %s269_s9 = scalar_lea.vmem [#allocation8], %s1345_s8  ;;  %s1234_s12 = scalar_lea.sflag [#allocation4], %s2033_s15 }
  0x6e   : > { %942 = vmatprep.subr.bf16.mxu1 %v1602_v25  ;;  %v1659_v8 = vld [vmem:[#allocation5 + $0x270] ss:$8 sps:$4 sm:$0xff]   ;;  %v1664_v9 = vld [vmem:[#allocation5 + $0x264] ss:$8 sps:$4 sm:$0xff]   ;;  %v280_v10 = vpack.c.bf16 %v273_v6, %v273_v6  ;;  %v1704_v11 = vld [vmem:[#allocation5 + $0x300] ss:$8 sps:$4 sm:$0xff]   ;;  %v283_v17 = vpack.c.bf16 %v276_v16, %v276_v16 }
  0x6f   : > { %v1706_v12 = vld [vmem:[#allocation5 + $0x304] ss:$8 sps:$4 sm:$0xff]   ;;  %v1662_v13 = vld [vmem:[#allocation5 + $0x260] ss:$8 sps:$4 sm:$0xff]   ;;  %v1667_v14 = vld [vmem:[#allocation5 + $0x254] ss:$8 sps:$4 sm:$0xff]  }
  0x70   : > { %902 = vmatpush1.bf16.msra.mxu0 %v1601_v26  ;;  %v277_v15 = vld [vmem:[%s2037_s27 + $0x30] sm:$0xff]  ;;  %v383_v16 = vld [vmem:[%s2105_s2] sm:$0x3]  ;;  %s1247_s6 = sshll.u32 %s269_s9, 4  ;;  %p2124_p11 = scmp.ne.s32.totalorder %s2118_s30, 0  ;;  %s1248_s6 = int_to_ptr.vmem [resolvable:$true] %s1247_s6 }
  0x71   : > { %903 = vmatprep.subr.bf16.mxu0 %v1605_v27  ;;  %943 = vmatpush1.bf16.msra.mxu1 %v1604_v28  ;;  %v1665_v18 = vld [vmem:[#allocation5 + $0x250] ss:$8 sps:$4 sm:$0xff]   ;;  %v1670_v20 = vld [vmem:[#allocation5 + $0x244] ss:$8 sps:$4 sm:$0xff]   ;;  %v284_v21 = vpack.c.bf16 %v277_v15, %v277_v15  ;;  %v1668_v22 = vld [vmem:[#allocation5 + $0x240] ss:$8 sps:$4 sm:$0xff]  }
  0x72   : > { %944 = vmatprep.subr.bf16.mxu1 %v1608_v29  ;;  %v1673_v23 = vld [vmem:[#allocation5 + $0x234] ss:$8 sps:$4 sm:$0xff]   ;;  %v1671_v24 = vld [vmem:[#allocation5 + $0x230] ss:$8 sps:$4 sm:$0xff]   ;;  %v1676_v25 = vld [vmem:[#allocation5 + $0x224] ss:$8 sps:$4 sm:$0xff]  }
  0x73   : > { %v1674_v26 = vld [vmem:[#allocation5 + $0x220] ss:$8 sps:$4 sm:$0xff]   ;;  %v1679_v27 = vld [vmem:[#allocation5 + $0x214] ss:$8 sps:$4 sm:$0xff]   ;;  %v1677_v28 = vld [vmem:[#allocation5 + $0x210] ss:$8 sps:$4 sm:$0xff]  }
  0x74   : > { %904 = vmatpush1.bf16.msra.mxu0 %v1607_v30  ;;  %v1682_v29 = vld [vmem:[#allocation5 + $0x204] ss:$8 sps:$4 sm:$0xff]   ;;  %v1680_v30 = vld [vmem:[#allocation5 + $0x200] ss:$8 sps:$4 sm:$0xff]   ;;  %s1806_s16 = scalar_lea.vmem %s1248_s6, 128  ;;  %s1884_s22 = smov [#allocation8]  }
  0x75   : > { %905 = vmatprep.subr.bf16.mxu0 %v1611_v31  ;;  %945 = vmatpush1.bf16.msra.mxu1 %v1610_v32  ;;  %v1685_v31 = vld [vmem:[#allocation5 + $0x2f4] ss:$8 sps:$4 sm:$0xff]   ;;  %v1683_v32 = vld [vmem:[#allocation5 + $0x2f0] ss:$8 sps:$4 sm:$0xff]   ;;  %v1707_v46 = vld [vmem:[#allocation5 + $0x280] ss:$8 sps:$4 sm:$0xff]   ;;  %p1807_p7 = scmp.ne.s32.totalorder %s1248_s6, %s1806_s16 }
  0x76   : > { %946 = vmatprep.subr.bf16.mxu1 %v1614_v33  ;;  %v1688_v33 = vld [vmem:[#allocation5 + $0x2e4] ss:$8 sps:$4 sm:$0xff]   ;;  %s1810_s23 = sshll.u32 %s1884_s22, 4  ;;  %s1811_s23 = int_to_ptr.vmem [resolvable:$false] %s1810_s23 }
  0x77   : > { %v1713_v52 = vld [vmem:[#allocation7 + $0x30] sm:$0xff]   ;;  %p1808_p1 = pnand %p1807_p7, %p2124_p11  ;;  %p1813_p6 = scmp.lt.s32.totalorder %s1248_s6, %s1811_s23 }
  0x78   : > { %906 = vmatpush2.bf16.msra.mxu0 %v1613_v34  ;;  %v1686_v34 = vld [vmem:[#allocation5 + $0x2e0] ss:$8 sps:$4 sm:$0xff]  }
  0x79   : > { %907 = vmatprep.subr.bf16.mxu0 %v1617_v35  ;;  %947 = vmatpush2.bf16.msra.mxu1 %v1616_v36  ;;  %v1691_v35 = vld [vmem:[#allocation5 + $0x2d4] ss:$8 sps:$4 sm:$0xff]   ;;  %v1689_v36 = vld [vmem:[#allocation5 + $0x2d0] ss:$8 sps:$4 sm:$0xff]   ;;  %p1809_p2 = pneg %p1808_p1 }
  0x7a   : > { %948 = vmatprep.subr.bf16.mxu1 %v1620_v37  ;;  %v1694_v37 = vld [vmem:[#allocation5 + $0x2c4] ss:$8 sps:$4 sm:$0xff]  }
  0x7c   : > { %908 = vmatpush2.bf16.msra.mxu0 %v1619_v38  ;;  %v1692_v38 = vld [vmem:[#allocation5 + $0x2c0] ss:$8 sps:$4 sm:$0xff]  }
  0x7d   : > { %909 = vmatprep.subr.bf16.mxu0 %v1623_v39  ;;  %949 = vmatpush2.bf16.msra.mxu1 %v1622_v40  ;;  %v1697_v39 = vld [vmem:[#allocation5 + $0x2b4] ss:$8 sps:$4 sm:$0xff]   ;;  %v1695_v40 = vld [vmem:[#allocation5 + $0x2b0] ss:$8 sps:$4 sm:$0xff]  }
  0x7e   : > { %950 = vmatprep.subr.bf16.mxu1 %v1626_v41  ;;  %v1700_v41 = vld [vmem:[#allocation5 + $0x2a4] ss:$8 sps:$4 sm:$0xff]  }
  0x80   : > { %910 = vmatpush2.bf16.msra.mxu0 %v1625_v42  ;;  %v1698_v42 = vld [vmem:[#allocation5 + $0x2a0] ss:$8 sps:$4 sm:$0xff]  }
  0x81   : > { %911 = vmatprep.subr.bf16.mxu0 %v1629_v43  ;;  %951 = vmatpush2.bf16.msra.mxu1 %v1628_v44  ;;  %v1703_v43 = vld [vmem:[#allocation5 + $0x294] ss:$8 sps:$4 sm:$0xff]   ;;  %v1701_v44 = vld [vmem:[#allocation5 + $0x290] ss:$8 sps:$4 sm:$0xff]  }
  0x82   : > { %952 = vmatprep.subr.bf16.mxu1 %v1632_v45  ;;  %v1709_v45 = vld [vmem:[#allocation5 + $0x284] ss:$8 sps:$4 sm:$0xff]  }
  0x84   : > { %912 = vmatpush2.bf16.msra.mxu0 %v1631_v47  ;;  %v275_v47 = vld [vmem:[%s2037_s27 + $0x20] sm:$0xff]  ;;  %s1812_s27 = scalar_lea.vmem %s1811_s23, 256 }
  0x85   : > { %913 = vmatprep.subr.bf16.mxu0 %v1635_v49  ;;  %953 = vmatpush2.bf16.msra.mxu1 %v1634_v51  ;;  %v282_v48 = vpack.c.bf16 %v275_v47, %v275_v47  ;;  %v1710_v49 = vld [vmem:[#allocation7 + $0x78] sm:$0xff]   ;;  %v1712_v51 = vld [vmem:[#allocation7 + $0x70] sm:$0xff]   ;;  %p1814_p12 = scmp.lt.s32.totalorder %s1812_s27, %s1806_s16 }
  0x86   : > { %954 = vmatprep.subr.bf16.mxu1 %v1638_v53  ;;  %v1714_v53 = vld [vmem:[#allocation7 + $0x68] sm:$0xff]  }
  0x87   : > { %p1815_p3 = por %p1814_p12, %p1813_p6 }
  0x88   : > { %914 = vmatpush2.bf16.msra.mxu0 %v1637_v54  ;;  %v1715_v54 = vld [vmem:[#allocation7 + $0x28] sm:$0xff]  }
  0x89   : > { %915 = vmatprep.subr.bf16.mxu0 %v1641_v55  ;;  %955 = vmatpush2.bf16.msra.mxu1 %v1640_v56  ;;  %v1716_v55 = vld [vmem:[#allocation7 + $0x60] sm:$0xff]   ;;  %p1816_p9 = pnand %p1815_p3, %p1809_p2 }
  0x8a   : > { %956 = vmatprep.subr.bf16.mxu1 %v1644_v57  ;;  %v1717_v56 = vld [vmem:[#allocation7 + $0x20] sm:$0xff]   ;;  %v1718_v57 = vld [vmem:[#allocation7 + $0x58] sm:$0xff]  }
  0x8c   : > { %916 = vmatpush2.bf16.msra.mxu0 %v1643_v58  ;;  %v1719_v58 = vld [vmem:[#allocation7 + $0x18] sm:$0xff]  }
  0x8d   : > { %917 = vmatprep.subr.bf16.mxu0 %v1647_v59  ;;  %957 = vmatpush2.bf16.msra.mxu1 %v1646_v60  ;;  %v1720_v59 = vld [vmem:[#allocation7 + $0x50] sm:$0xff]  }
  0x8e   : > { %958 = vmatprep.subr.bf16.mxu1 %v1650_v61  ;;  %v1721_v60 = vld [vmem:[#allocation7 + $0x10] sm:$0xff]   ;;  %v1722_v61 = vld [vmem:[#allocation7 + $0x48] sm:$0xff]  }
  0x90   : > { %918 = vmatpush2.bf16.msra.mxu0 %v1649_v62  ;;  %v1723_v62 = vld [vmem:[#allocation7 + $0x8] sm:$0xff]  }
  0x91   : > { %919 = vmatprep.subr.bf16.mxu0 %v1653_v63  ;;  %959 = vmatpush2.bf16.msra.mxu1 %v1652_v0  ;;  %v1724_v63 = vld [vmem:[#allocation7 + $0x40] sm:$0xff]  }
  0x92   : > { %960 = vmatprep.subr.bf16.mxu1 %v1656_v2  ;;  %v1725_v0 = vld [vmem:[#allocation7] sm:$0xff]  }
  0x94   : > { %920 = vmatpush2.bf16.msra.mxu0 %v1655_v1 }
  0x95   : > { %971 = vmatprep.subr.bf16.mxu0 %v1661_v5  ;;  %961 = vmatpush2.bf16.msra.mxu1 %v1658_v3 }
  0x96   : > { %1026 = vmatprep.subr.bf16.mxu1 %v1706_v12 }
  0x97   : > { %922 = vmatmul.mubr.bf16.vlgmr.msra.gmra.mxu0 %v278_v7 }
  0x98   : > { %972 = vmatpush1.bf16.msra.mxu0 %v1659_v8  ;;  %963 = vmatmul.mubr.bf16.vlgmr.msra.gmra.mxu1 %v280_v10 }
  0x99   : > { %973 = vmatprep.subr.bf16.mxu0 %v1664_v9  ;;  %1027 = vmatpush1.bf16.msra.mxu1 %v1704_v11 }
  0x9a   : > { %1044 = vmatprep.mubr.bf16.mxu1 %v1883_v19  ;;  %1003 = vmatprep.mubr.bf16.mxu0 %v283_v17 }
  0x9b   : > { %1466 = vmatprep.subr.bf16.mxu1 %v1710_v49 }
  0x9c   : > { %974 = vmatpush1.bf16.msra.mxu0 %v1662_v13  ;;  %v385_v13 = vlaneseq }
  0x9d   : > { %975 = vmatprep.subr.bf16.mxu0 %v1667_v14 }
  0x9e   : > { %v386_v14 = vshrl.u32 %v385_v13, 7 }
  0xa0   : > { %976 = vmatpush1.bf16.msra.mxu0 %v1665_v18  ;;  %1444 = vmatmul.mubr.msk.bf16.vlgmr.msra.gmra.mxu1 %vm885_vm0, %v284_v21  ;;  %v387_v15 = vsub.s32 0, %v386_v14  ;;  %v391_v17 = vsub.s32 1, %v386_v14 }
  0xa1   : > { %977 = vmatprep.subr.bf16.mxu0 %v1670_v20  ;;  %1467 = vmatpush3.bf16.msra.mxu1 %v1711_v50 }
  0xa2   : > { %1468 = vmatprep.subr.bf16.mxu1 %v1712_v51  ;;  %v388_v18 = vrot.slane %v383_v16, %v387_v15  ;;  %v392_v19 = vrot.slane %v383_v16, %v391_v17 }
  0xa4   : > { %978 = vmatpush1.bf16.msra.mxu0 %v1668_v22 }
  0xa5   : > { %979 = vmatprep.subr.bf16.mxu0 %v1673_v23  ;;  %1469 = vmatpush3.bf16.msra.mxu1 %v1713_v52 }
  0xa6   : > { %1470 = vmatprep.subr.bf16.mxu1 %v1714_v53 }
  0xa8   : > { %980 = vmatpush1.bf16.msra.mxu0 %v1671_v24 }
  0xa9   : > { %981 = vmatprep.subr.bf16.mxu0 %v1676_v25  ;;  %1471 = vmatpush3.bf16.msra.mxu1 %v1715_v54 }
  0xaa   : > { %1472 = vmatprep.subr.bf16.mxu1 %v1716_v55 }
  0xac   : > { %982 = vmatpush1.bf16.msra.mxu0 %v1674_v26 }
  0xad   : > { %983 = vmatprep.subr.bf16.mxu0 %v1679_v27  ;;  %1473 = vmatpush3.bf16.msra.mxu1 %v1717_v56 }
  0xae   : > { %1474 = vmatprep.subr.bf16.mxu1 %v1718_v57 }
  0xb0   : > { %984 = vmatpush1.bf16.msra.mxu0 %v1677_v28 }
  0xb1   : > { %985 = vmatprep.subr.bf16.mxu0 %v1682_v29  ;;  %1475 = vmatpush3.bf16.msra.mxu1 %v1719_v58 }
  0xb2   : > { %1476 = vmatprep.subr.bf16.mxu1 %v1720_v59 }
  0xb4   : > { %986 = vmatpush1.bf16.msra.mxu0 %v1680_v30 }
  0xb5   : > { %987 = vmatprep.subr.bf16.mxu0 %v1685_v31  ;;  %1477 = vmatpush3.bf16.msra.mxu1 %v1721_v60 }
  0xb6   : > { %1478 = vmatprep.subr.bf16.mxu1 %v1722_v61 }
  0xb8   : > { %988 = vmatpush2.bf16.msra.mxu0 %v1683_v32 }
  0xb9   : > { %989 = vmatprep.subr.bf16.mxu0 %v1688_v33  ;;  %1479 = vmatpush3.bf16.msra.mxu1 %v1723_v62 }
  0xba   : > { %1480 = vmatprep.subr.bf16.mxu1 %v1724_v63 }
  0xbc   : > { %990 = vmatpush2.bf16.msra.mxu0 %v1686_v34 }
  0xbd   : > { %991 = vmatprep.subr.bf16.mxu0 %v1691_v35  ;;  %1481 = vmatpush3.bf16.msra.mxu1 %v1725_v0 }
  0xc0   : > { %992 = vmatpush2.bf16.msra.mxu0 %v1689_v36 }
  0xc1   : > { %993 = vmatprep.subr.bf16.mxu0 %v1694_v37  ;;  %v1445_v37 = vld [vmem:[%s2107_s4] ss:$0 sm:$0xff] }
  0xc4   : > { %994 = vmatpush2.bf16.msra.mxu0 %v1692_v38 }
  0xc5   : > { %995 = vmatprep.subr.bf16.mxu0 %v1697_v39 }
  0xc8   : > { %996 = vmatpush2.bf16.msra.mxu0 %v1695_v40 }
  0xc9   : > { %997 = vmatprep.subr.bf16.mxu0 %v1700_v41 }
  0xcc   : > { %998 = vmatpush2.bf16.msra.mxu0 %v1698_v42 }
  0xcd   : > { %999 = vmatprep.subr.bf16.mxu0 %v1703_v43 }
  0xd0   : > { %1000 = vmatpush2.bf16.msra.mxu0 %v1701_v44 }
  0xd1   : > { %1001 = vmatprep.subr.bf16.mxu0 %v1709_v45 }
  0xd4   : > { %1002 = vmatpush2.bf16.msra.mxu0 %v1707_v46 }
  0xd7   : > { %1004 = vmatmul.mubr.bf16.vlgmr.msra.gmra.mxu0 %v282_v48 }
 0x157   : > { %v923_v1 = vpop.f32.mrf.mxu0 }
 0x158   : > { %v964_v3 = vpop.f32.mrf.mxu1  ;;  %v924_v20 = vadd.f32 %v923_v1, %v388_v18 }
 0x159   : > { %v925_v2 = vpop.f32.mrf.mxu0 }
 0x15a   : > { %v966_v5 = vpop.f32.mrf.mxu1  ;;  %v926_v21 = vadd.f32 %v925_v2, %v392_v19  ;;  %v965_v22 = vadd.f32 %v964_v3, %v924_v20 }
 0x15b   : > { %v927_v4 = vpop.f32.mrf.mxu0 }
 0x15c   : > { %v968_v7 = vpop.f32.mrf.mxu1  ;;  %v967_v24 = vadd.f32 %v966_v5, %v926_v21 }
 0x15d   : > { %v928_v6 = vpop.f32.mrf.mxu0 }
 0x15e   : > { %v969_v8 = vpop.f32.mrf.mxu1 }
 0x160   : > { %v1046_v9 = vpop.f32.mrf.mxu1 }
 0x162   : > { %v1048_v10 = vpop.f32.mrf.mxu1 }
 0x164   : > { %v1050_v11 = vpop.f32.mrf.mxu1 }
 0x166   : > { %v1051_v12 = vpop.f32.mrf.mxu1 }
 0x197   : > { %v1005_v23 = vpop.f32.mrf.mxu0 }
 0x198   : > { %v1006_v25 = vadd.f32 %v1005_v23, %v965_v22 }
 0x199   : > { %v1007_v26 = vpop.f32.mrf.mxu0 }
 0x19a   : > { %v1047_v27 = vadd.f32 %v1046_v9, %v1006_v25  ;;  %v1008_v28 = vadd.f32 %v1007_v26, %v967_v24 }
 0x19b   : > { %v1009_v29 = vpop.f32.mrf.mxu0 }
 0x19c   : > { %v1049_v30 = vadd.f32 %v1048_v10, %v1008_v28  ;;  %v1053_v31 = vmax.f32 %v1047_v27, 0.0 }
 0x19d   : > { %v1010_v32 = vpop.f32.mrf.mxu0 }
 0x19e   : > { %v1054_v33 = vmax.f32 %v1049_v30, 0.0  ;;  %v1055_v35 = vpack.c.bf16 %v1053_v31, %v1053_v31 }
 0x1a0   : > { %v1056_v34 = vpack.c.bf16 %v1054_v33, %v1054_v33 }
 0x1a2   : > { %1224 = vmatprep.mubr.bf16.mxu1 %v1056_v34 }
 0x1a3   : > { %1225 = vmatmul.mubr.bf16.vlgmr.msra.gmra.mxu1 %v1055_v35 }
 0x263   : > { %v1482_v36 = vpop.f32.mrf.mxu1 }
 0x265   : > { %v1483_v38 = vpop.f32.mrf.mxu1 }
 0x266   : > { %v1484_v39 = vadd.f32 %v1483_v38, %v1482_v36 }
 0x267   : > { %v1485_v40 = vpop.f32.mrf.mxu1 }
 0x268   : > { %v1227_v41 = vadd.f32 %v1484_v39, %v1445_v37 }
 0x269   : > { %v1486_v42 = vpop.f32.mrf.mxu1 }
 0x26a   : > { %1232 = vst [vmem:[%s269_s9] sm:$0xff] %v1227_v41 }
 0x26b   : > { %1819 = shalt.err (!%p1816_p9)
}
 0x26c   : > { %s1820_s24 = scalar_lea.hbm %s2066_s10, 128  ;;  %s1824_s8 = scalar_lea.hbm %s2108_s5, 256 }
 0x26d   : > { %p1821_p13 = scmp.ne.s32.totalorder %s2066_s10, %s1820_s24  ;;  %p1825_p0 = scmp.lt.s32.totalorder %s2066_s10, %s2108_s5 }
 0x26e   : > { %p1826_p4 = scmp.lt.s32.totalorder %s1824_s8, %s1820_s24 }
 0x26f   : > { %p1822_p5 = pnand %p1821_p13, %p2124_p11 }
 0x270   : > { %p1827_p8 = por %p1826_p4, %p1825_p0 }
 0x271   : > { %p1823_p10 = pneg %p1822_p5 }
 0x273   : > { %p1828_p7 = pnand %p1827_p8, %p1823_p10 }
 0x275   : > { %1831 = shalt.err (!%p1828_p7)
}
 0x276   : > { %1501 = dma.vmem_to_hbm [thread:$0]  (%p2124_p11), %s1248_s6, 128, %s2066_s10, %s1234_s12  }
 0x277 PF: > { %s1259_s14 = sand.u32 1, %s1862_s18   ;;  %p2125_p1 = scmp.ne.s32.totalorder %s2114_s25, 0 }
 0x278   : > { %p2126_p2 = scmp.ge.s32.totalorder %s1874_s21, 2  ;;  %s1260_s9 = scalar_lea.sflag [#allocation4], %s1259_s14 }
 0x27a   : > { %p1515_p6 = pnand %p2126_p2, %p2125_p1 }
 0x27c   : > { %p1516_p12 = pneg %p1515_p6 }
 0x27e   : > { %1857 = dma.done.wait (%p1516_p12), %s1260_s9, 128  }
 0x27f   : > { %1859 = vsyncadd (%p1516_p12), %s1260_s9, 4294967168  ;;  %p19_p3 = scmp.ge.s32.totalorder %s1987_s17, 4   ;;  %s2127_s18 = smov %s1866_s19 }
 0x280   : > { %s2128_s19 = smov %s1870_s20  ;;  %s2129_s20 = smov %s1996_s28 }
 0x281   : > { %s2130_s21 = smov %s1987_s17  ;;  %21 = sbr.rel (!%p19_p3) target bundleno = 6 (0x6), region = 93 }
 0x286   :  { %1265 = vsyncpa [#allocation3], 1 }
 0x287   :  { %1267 = vsyncpa [#allocation3 + $0x1], 1 }
 0x288   :  { %1268 = vsyncpa [#allocation6], 1 }
 0x289   :  { %1269 = vsyncpa [#allocation4], 1 }
 0x28a   :  { %1271 = vsyncpa [#allocation4 + $0x1], 1 }

</bundles_post_ra>
